<compile_context>
chip_gen: v7x
topology: tpu7x:2x2x1
jax: 0.10.0
libtpu: 0.0.40
codegen_flags: <defaults>
</compile_context>

<pallas_src>
import functools

import jax
import jax.numpy as jnp
import numpy as np
from jax.experimental import pallas as pl
from jax.experimental.pallas import tpu as pltpu

NEG_SLOPE = 0.01      # PyTorch LeakyReLU default
_MASK_VAL = -1e30     # score for padded lanes (exp -> 0 under softmax)


def _attention_kernel(enc_ref, wae_ref, hs_ref, wv_ref, out_ref, m_ref,
                      *, src_len, lane_tile):
    # enc_ref : [E, TILE]   enc_output.T lane tile (zero-padded past src_len)
    # wae_ref : [H, E]      W_attn columns for the encoder half of the concat
    # hs_ref  : [H, 1]      W_attn[:, :D] @ s.T (decoder-state projection, per call)
    # wv_ref  : [H, 1]      w_v.T
    # out_ref : [T, TILE]   resident score slab; row i = scores of lane tile i
    # m_ref   : [1, 1]      running-max scratch (VMEM)
    i = pl.program_id(0)

    @pl.when(i == 0)
    def _init():
        m_ref[...] = jnp.full_like(m_ref, _MASK_VAL)

    # h[:, j] = W_attn[:, D:] @ enc[j, :] + W_attn[:, :D] @ s     -> [H, TILE]
    h = jnp.dot(wae_ref[...], enc_ref[...], preferred_element_type=jnp.float32)
    h = h + hs_ref[...]                          # lane-broadcast of the [H, 1] column
    h = jnp.where(h >= 0, h, NEG_SLOPE * h)      # LeakyReLU (VPU)

    # v-projection as VPU multiply + sublane reduce (avoids an N=1 MXU matmul).
    att = jnp.sum(h * wv_ref[...], axis=0, keepdims=True)         # [1, TILE]

    # Mask lanes past the real src_len so they vanish under softmax.
    lane = jax.lax.broadcasted_iota(jnp.int32, (1, lane_tile), 1) + i * lane_tile
    att = jnp.where(lane < src_len, att, jnp.float32(_MASK_VAL))

    # Stash raw (lane-dense) scores and track the global max.
    out_ref[pl.ds(i, 1), :] = att
    m_ref[...] = jnp.maximum(m_ref[...], jnp.max(att, axis=1, keepdims=True))

    @pl.when(i == pl.num_programs(0) - 1)
    def _finalize():
        e = jnp.exp(out_ref[...] - m_ref[...])                     # [T, TILE]
        tot = jnp.sum(jnp.sum(e, axis=1, keepdims=True), axis=0, keepdims=True)
        out_ref[...] = e * pl.reciprocal(tot, approx=True)


def prepare_attention_params(w_attn, w_v, dec_hid_dim):
    """One-time weight prep, hoisted out of the per-call path.

    w_attn: [H, D + E] (PyTorch Linear layout), w_v: [1, H].
    Returns (w_attn_s [H, D], w_attn_e [H, E], wv_col [H, 1]).
    """
    w_attn_s = w_attn[:, :dec_hid_dim]
    w_attn_e = w_attn[:, dec_hid_dim:]
    wv_col = w_v.T
    return w_attn_s, w_attn_e, wv_col


def _pick_lane_tile(src_len):
    # Small src_len: a single lane-aligned tile. Large src_len: 512-lane tiles
    # (kept modest so double-buffered enc tiles stay far below v7x's 64 MiB VMEM).
    if src_len > 512:
        return 512
    return max(128, pl.cdiv(src_len, 128) * 128)


@jax.jit
def attention_forward(s, enc_output, w_attn_s, w_attn_e, wv_col):
    """s: [1, D], enc_output: [S, E] with D == E. Returns softmax attention [1, S]."""
    S, E = enc_output.shape
    N, D = s.shape
    H = w_attn_e.shape[0]
    assert N == 1, "PyTorch forward only valid for s.shape[0] == 1 (torch.cat dim-0 match)"
    assert D == E, "PyTorch .view() requires enc_hid_dim == dec_hid_dim"

    lane_tile = _pick_lane_tile(S)
    num_tiles = pl.cdiv(S, lane_tile)
    s_pad = num_tiles * lane_tile

    # Per-call prep (tiny fused XLA ops under jit): decoder-state projection and
    # the lane-major, lane-padded view of enc_output.
    hs_col = jnp.dot(w_attn_s, s.T)                              # [H, 1]
    enc_t = jnp.pad(enc_output.T, ((0, 0), (0, s_pad - S)))      # [E, S_pad]

    grid_spec = pltpu.PrefetchScalarGridSpec(
        num_scalar_prefetch=0,
        grid=(num_tiles,),
        in_specs=[
            pl.BlockSpec((E, lane_tile), lambda i: (0, i)),      # streamed enc tile
            pl.BlockSpec((H, E), lambda i: (0, 0)),              # resident weights
            pl.BlockSpec((H, 1), lambda i: (0, 0)),
            pl.BlockSpec((H, 1), lambda i: (0, 0)),
        ],
        # Constant index map -> whole score slab is VMEM-resident across the
        # grid (accumulator pattern); finalized in the last step.
        out_specs=pl.BlockSpec((num_tiles, lane_tile), lambda i: (0, 0)),
        scratch_shapes=[pltpu.VMEM((1, 1), jnp.float32)],
    )

    scores = pl.pallas_call(
        functools.partial(_attention_kernel, src_len=S, lane_tile=lane_tile),
        out_shape=jax.ShapeDtypeStruct((num_tiles, lane_tile), jnp.float32),
        grid_spec=grid_spec,
        compiler_params=pltpu.CompilerParams(dimension_semantics=("arbitrary",)),
    )(enc_t, w_attn_e, hs_col, wv_col)

    # Contiguous reshape to a lane-dense row, then drop the padded lanes.
    return scores.reshape(1, s_pad)[:, :S]


def attention_reference(s, enc_output, w_attn, w_v):
    """Pure-JAX reference matching the PyTorch forward."""
    S, E = enc_output.shape
    s_rep = jnp.broadcast_to(s[:, None, :], (1, S, E))           # repeat + view
    enc = enc_output[None, :, :]                                 # unsqueeze(0)
    x = jnp.concatenate([s_rep, enc], axis=2)                    # [1, S, D+E]
    score = x @ w_attn.T                                         # [1, S, H]
    score = jnp.where(score >= 0, score, NEG_SLOPE * score)      # LeakyReLU
    att = (score @ w_v.T)[..., 0]                                # [1, S]
    return jax.nn.softmax(att, axis=1)


if __name__ == "__main__":
    enc_hid_dim = 32
    dec_hid_dim = 32   # must equal enc_hid_dim (module's .view / .cat constraints)

    key = jax.random.PRNGKey(0)
    k1, k2, k3, k4 = jax.random.split(key, 4)

    # Deterministic parameters (PyTorch Linear layout: [out_features, in_features]).
    fan_in_attn = enc_hid_dim + dec_hid_dim
    w_attn = (jax.random.normal(k1, (dec_hid_dim, fan_in_attn), jnp.float32)
              / jnp.sqrt(fan_in_attn))
    w_v = (jax.random.normal(k2, (1, dec_hid_dim), jnp.float32)
           / jnp.sqrt(dec_hid_dim))

    # One-time weight prep, hoisted out of the per-call path.
    w_attn_s, w_attn_e, wv_col = prepare_attention_params(w_attn, w_v, dec_hid_dim)

    s = jax.random.normal(k3, (1, dec_hid_dim), jnp.float32)

    # Exercise both the single-tile path (src_len=8) and the multi-tile
    # grid / lane-masking path (src_len=600 -> two 512-lane tiles).
    for src_len in (8, 600):
        enc_output = jax.random.normal(jax.random.fold_in(k4, src_len),
                                       (src_len, enc_hid_dim), jnp.float32)
        out = attention_forward(s, enc_output, w_attn_s, w_attn_e, wv_col)
        out = jax.block_until_ready(out)

        ref = attention_reference(s, enc_output, w_attn, w_v)
        np.testing.assert_allclose(np.asarray(out), np.asarray(ref),
                                   rtol=2e-3, atol=1e-6)
        assert out.shape == (1, src_len)

    print("KERNEL_OK")
</pallas_src>

<mosaic_0001>
module attributes {stable_mosaic.version = 11 : i64} {
  func.func @_attention_kernel(%arg0: i32, %arg1: memref<32x128xf32, #tpu.memory_space<vmem>>, %arg2: memref<32x32xf32, #tpu.memory_space<vmem>>, %arg3: memref<32x1xf32, #tpu.memory_space<vmem>>, %arg4: memref<32x1xf32, #tpu.memory_space<vmem>>, %arg5: memref<1x128xf32, #tpu.memory_space<vmem>>, %arg6: memref<1x1xf32, #tpu.memory_space<vmem>>) attributes {dimension_semantics = [#tpu.dimension_semantics<arbitrary>], iteration_bounds = array<i64: 1>, scalar_prefetch = 0 : i64, scratch_operands = 1 : i64, tpu.core_type = #tpu.core_type<tc>, window_params = [{transform_indices = @transform_0, window_bounds = array<i64: 32, 128>}, {pipeline_mode = #tpu.pipeline_mode<synchronous>, transform_indices = @transform_1, window_bounds = array<i64: 32, 32>}, {pipeline_mode = #tpu.pipeline_mode<synchronous>, transform_indices = @transform_2, window_bounds = array<i64: 32, 1>}, {pipeline_mode = #tpu.pipeline_mode<synchronous>, transform_indices = @transform_3, window_bounds = array<i64: 32, 1>}, {pipeline_mode = #tpu.pipeline_mode<synchronous>, transform_indices = @transform_4, window_bounds = array<i64: 1, 128>}]} {
    %c0_i32 = arith.constant 0 : i32
    %0 = arith.cmpi eq, %arg0, %c0_i32 : i32
    %1 = arith.extui %0 : i1 to i32
    %c0_i32_0 = arith.constant 0 : i32
    %2 = arith.cmpi ne, %1, %c0_i32_0 : i32
    scf.if %2 {
      %cst_20 = arith.constant -1.000000e+30 : f32
      %37 = vector.broadcast %cst_20 : f32 to vector<1x1xf32>
      %c0_21 = arith.constant 0 : index
      %c0_22 = arith.constant 0 : index
      %38 = vector.load %arg6[%c0_21, %c0_22] : memref<1x1xf32, #tpu.memory_space<vmem>>, vector<1x1xf32>
      tpu.vector_store %arg6[%c0_21, %c0_22], %37 {strides = array<i32>} : memref<1x1xf32, #tpu.memory_space<vmem>>, vector<1x1xf32>,
    } else {
    }
    %c0 = arith.constant 0 : index
    %c0_1 = arith.constant 0 : index
    %3 = vector.load %arg2[%c0, %c0_1] : memref<32x32xf32, #tpu.memory_space<vmem>>, vector<32x32xf32>
    %c0_2 = arith.constant 0 : index
    %c0_3 = arith.constant 0 : index
    %4 = vector.load %arg1[%c0_2, %c0_3] : memref<32x128xf32, #tpu.memory_space<vmem>>, vector<32x128xf32>
    %cst = arith.constant dense<0.000000e+00> : vector<32x128xf32>
    %5 = tpu.matmul %3, %4, %cst {dimension_numbers = #tpu.dot_dimension_numbers<[1], [0], [0], [1], [0, 0, 1, 1], [], []>} : vector<32x32xf32>, vector<32x128xf32>, vector<32x128xf32> -> vector<32x128xf32>
    %c0_4 = arith.constant 0 : index
    %c0_5 = arith.constant 0 : index
    %6 = vector.load %arg3[%c0_4, %c0_5] : memref<32x1xf32, #tpu.memory_space<vmem>>, vector<32x1xf32>
    %7 = vector.broadcast %6 : vector<32x1xf32> to vector<32x128xf32>
    %8 = arith.addf %5, %7 : vector<32x128xf32>
    %cst_6 = arith.constant 0.000000e+00 : f32
    %9 = vector.broadcast %cst_6 : f32 to vector<32x128xf32>
    %10 = arith.cmpf oge, %8, %9 : vector<32x128xf32>
    %cst_7 = arith.constant 0.00999999977 : f32
    %11 = vector.broadcast %cst_7 : f32 to vector<32x128xf32>
    %12 = arith.mulf %11, %8 : vector<32x128xf32>
    %13 = arith.select %10, %8, %12 : vector<32x128xi1>, vector<32x128xf32>
    %c0_8 = arith.constant 0 : index
    %c0_9 = arith.constant 0 : index
    %14 = vector.load %arg4[%c0_8, %c0_9] : memref<32x1xf32, #tpu.memory_space<vmem>>, vector<32x1xf32>
    %15 = vector.broadcast %14 : vector<32x1xf32> to vector<32x128xf32>
    %16 = arith.mulf %13, %15 : vector<32x128xf32>
    %cst_10 = arith.constant dense<0.000000e+00> : vector<128xf32>
    %17 = vector.multi_reduction <add>, %16, %cst_10 [0] : vector<32x128xf32> to vector<128xf32>
    %18 = vector.shape_cast %17 : vector<128xf32> to vector<1x128xf32>
    %19 = tpu.iota {dimensions = array<i32: 1>} : vector<1x128xi32>
    %c128_i32 = arith.constant 128 : i32
    %20 = arith.muli %arg0, %c128_i32 : i32
    %21 = vector.broadcast %20 : i32 to vector<1x128xi32>
    %22 = arith.addi %19, %21 : vector<1x128xi32>
    %c8_i32 = arith.constant 8 : i32
    %23 = vector.broadcast %c8_i32 : i32 to vector<1x128xi32>
    %24 = arith.cmpi slt, %22, %23 : vector<1x128xi32>
    %cst_11 = arith.constant -1.000000e+30 : f32
    %25 = vector.broadcast %cst_11 : f32 to vector<1x128xf32>
    %26 = arith.select %24, %18, %25 : vector<1x128xi1>, vector<1x128xf32>
    %27 = arith.index_cast %arg0 : i32 to index
    %c0_12 = arith.constant 0 : index
    %28 = vector.load %arg5[%27, %c0_12] : memref<1x128xf32, #tpu.memory_space<vmem>>, vector<1x128xf32>
    tpu.vector_store %arg5[%27, %c0_12], %26 {strides = array<i32>} : memref<1x128xf32, #tpu.memory_space<vmem>>, vector<1x128xf32>,
    %c0_13 = arith.constant 0 : index
    %c0_14 = arith.constant 0 : index
    %29 = vector.load %arg6[%c0_13, %c0_14] : memref<1x1xf32, #tpu.memory_space<vmem>>, vector<1x1xf32>
    %cst_15 = arith.constant dense<0xFF800000> : vector<1xf32>
    %30 = vector.multi_reduction <maximumf>, %26, %cst_15 [1] : vector<1x128xf32> to vector<1xf32>
    %31 = vector.shape_cast %30 : vector<1xf32> to vector<1x1xf32>
    %32 = arith.maximumf %29, %31 : vector<1x1xf32>
    %c0_16 = arith.constant 0 : index
    %c0_17 = arith.constant 0 : index
    %33 = vector.load %arg6[%c0_16, %c0_17] : memref<1x1xf32, #tpu.memory_space<vmem>>, vector<1x1xf32>
    tpu.vector_store %arg6[%c0_16, %c0_17], %32 {strides = array<i32>} : memref<1x1xf32, #tpu.memory_space<vmem>>, vector<1x1xf32>,
    %c0_i32_18 = arith.constant 0 : i32
    %34 = arith.cmpi eq, %arg0, %c0_i32_18 : i32
    %35 = arith.extui %34 : i1 to i32
    %c0_i32_19 = arith.constant 0 : i32
    %36 = arith.cmpi ne, %35, %c0_i32_19 : i32
    scf.if %36 {
      %c0_20 = arith.constant 0 : index
      %c0_21 = arith.constant 0 : index
      %37 = vector.load %arg5[%c0_20, %c0_21] : memref<1x128xf32, #tpu.memory_space<vmem>>, vector<1x128xf32>
      %c0_22 = arith.constant 0 : index
      %c0_23 = arith.constant 0 : index
      %38 = vector.load %arg6[%c0_22, %c0_23] : memref<1x1xf32, #tpu.memory_space<vmem>>, vector<1x1xf32>
      %39 = vector.broadcast %38 : vector<1x1xf32> to vector<1x128xf32>
      %40 = arith.subf %37, %39 : vector<1x128xf32>
      %41 = math.exp %40 : vector<1x128xf32>
      %cst_24 = arith.constant dense<0.000000e+00> : vector<1xf32>
      %42 = vector.multi_reduction <add>, %41, %cst_24 [1] : vector<1x128xf32> to vector<1xf32>
      %43 = vector.shape_cast %42 : vector<1xf32> to vector<1x1xf32>
      %cst_25 = arith.constant dense<0.000000e+00> : vector<1xf32>
      %44 = vector.multi_reduction <add>, %43, %cst_25 [0] : vector<1x1xf32> to vector<1xf32>
      %45 = vector.shape_cast %44 : vector<1xf32> to vector<1x1xf32>
      %46 = tpu.reciprocal %45 {approx = true} : vector<1x1xf32> -> vector<1x1xf32>
      %47 = vector.broadcast %46 : vector<1x1xf32> to vector<1x128xf32>
      %48 = arith.mulf %41, %47 : vector<1x128xf32>
      %c0_26 = arith.constant 0 : index
      %c0_27 = arith.constant 0 : index
      %49 = vector.load %arg5[%c0_26, %c0_27] : memref<1x128xf32, #tpu.memory_space<vmem>>, vector<1x128xf32>
      tpu.vector_store %arg5[%c0_26, %c0_27], %48 {strides = array<i32>} : memref<1x128xf32, #tpu.memory_space<vmem>>, vector<1x128xf32>,
    } else {
    }
    return
  }
  func.func @transform_0(%arg0: i32) -> (i32, i32) {
    %c0_i32 = arith.constant 0 : i32
    %c0_i32_0 = arith.constant 0 : i32
    return %c0_i32, %arg0 : i32, i32
  }
  func.func @transform_1(%arg0: i32) -> (i32, i32) {
    %c0_i32 = arith.constant 0 : i32
    %c0_i32_0 = arith.constant 0 : i32
    %c0_i32_1 = arith.constant 0 : i32
    return %c0_i32, %c0_i32_0 : i32, i32
  }
  func.func @transform_2(%arg0: i32) -> (i32, i32) {
    %c0_i32 = arith.constant 0 : i32
    %c0_i32_0 = arith.constant 0 : i32
    %c0_i32_1 = arith.constant 0 : i32
    return %c0_i32, %c0_i32_0 : i32, i32
  }
  func.func @transform_3(%arg0: i32) -> (i32, i32) {
    %c0_i32 = arith.constant 0 : i32
    %c0_i32_0 = arith.constant 0 : i32
    %c0_i32_1 = arith.constant 0 : i32
    return %c0_i32, %c0_i32_0 : i32, i32
  }
  func.func @transform_4(%arg0: i32) -> (i32, i32) {
    %c0_i32 = arith.constant 0 : i32
    %c0_i32_0 = arith.constant 0 : i32
    %c0_i32_1 = arith.constant 0 : i32
    return %c0_i32, %c0_i32_0 : i32, i32
  }
}

</mosaic_0001>

<bundles_post_ra>
// kernel: attention_forward.1
= control target key start
LH: loop header
LB: loop body
LE: loop exit
PB: predicated region body
PF: predicated region fallthrough
CT: control target
= control target key end

     0   :  { %vm56_vm0 = vcmask 261120   ;;  %v327_v7 = vmov 0   ;;  %s419_s0 = inlined_call_operand.vmem [shape: f32[32,128], index: 0, kind: input, shape index: {}]   ;;  %s420_s1 = inlined_call_operand.vmem [shape: f32[32,32], index: 1, kind: input, shape index: {}]   ;;  %s421_s2 = inlined_call_operand.vmem [shape: f32[32,1], index: 2, kind: input, shape index: {}]   ;;  %s422_s3 = inlined_call_operand.vmem [shape: f32[32,1], index: 3, kind: input, shape index: {}]   ;;  %s423_s4 = inlined_call_operand.hbm [shape: f32[1,128], index: 4, kind: output, shape index: {}]  }
   0x1   :  { %v28_v0 = vld [vmem:[%s419_s0] sm:$0xff]  ;;  %v29_v1 = vld [vmem:[%s419_s0 + $0x8] sm:$0xff]  ;;  %v30_v2 = vld [vmem:[%s419_s0 + $0x10] sm:$0xff]  ;;  %297 = vset.pattern.permute.xlu0 %v327_v7  ;;  %298 = vset.pattern.permute.xlu1 %v327_v7 }
   0x2   :  { %v282_v3 = vpack.c.bf16 %v29_v1, %v28_v0  ;;  %v31_v4 = vld [vmem:[%s419_s0 + $0x18] sm:$0xff]  ;;  %v24_v5 = vld [vmem:[%s420_s1] sm:$0xff]  ;;  %v26_v6 = vld [vmem:[%s420_s1 + $0x10] sm:$0xff] }
   0x3   :  { %v286_v8 = vpack.c.bf16 %v31_v4, %v30_v2  ;;  %276 = vmatprep.mubr.msk.f32.mxu0 %vm56_vm0, %v24_v5  ;;  %279 = vmatprep.mubr.msk.f32.mxu1 %vm56_vm0, %v26_v6  ;;  %v32_v9 = vld [vmem:[%s421_s2] sm:$0xff]  ;;  %v34_v10 = vld [vmem:[%s421_s2 + $0x10] sm:$0xff] }
   0x4   :  { %283 = vmatprep.subr.bf16.mxu0 %v282_v3  ;;  %290 = vmatprep.subr.bf16.mxu1 %v282_v3 }
   0x5   :  { %285 = vmatpush3.bf16.msra.mxu0 %v282_v3  ;;  %292 = vmatpush3.bf16.msra.mxu1 %v282_v3 }
   0x6   :  { %287 = vmatprep.subr.bf16.mxu0 %v286_v8  ;;  %291 = vmatprep.subr.bf16.mxu1 %v286_v8 }
   0x7   :  { %9 = vsyncpa [#allocation4], 0  ;;  %38 = vperm.xlu0 %297, %v32_v9   ;;  %48 = vperm.xlu1 %298, %v34_v10   ;;  %v33_v11 = vld [vmem:[%s421_s2 + $0x8] sm:$0xff]  ;;  %v35_v12 = vld [vmem:[%s421_s2 + $0x18] sm:$0xff]  ;;  %v203_v51 = vlaneseq  ;;  %vm22_vm6 = vcmask 0   ;;  %vm234_vm7 = vcmask 1040384  }
   0x8   :  { %v25_v13 = vld [vmem:[%s420_s1 + $0x8] sm:$0xff]  ;;  %v27_v14 = vld [vmem:[%s420_s1 + $0x18] sm:$0xff]  ;;  %v166_v15 = vld [vmem:[%s422_s3] sm:$0xff]  ;;  %v328_v59 = vmov -1e+30  }
   0x9   :  { %289 = vmatpush3.bf16.msra.mxu0 %v286_v8  ;;  %293 = vmatpush3.bf16.msra.mxu1 %v286_v8  ;;  %v167_v16 = vld [vmem:[%s422_s3 + $0x8] sm:$0xff]  ;;  %v168_v17 = vld [vmem:[%s422_s3 + $0x10] sm:$0xff]  ;;  %v169_v18 = vld [vmem:[%s422_s3 + $0x18] sm:$0xff]  ;;  %v204_v54 = vand.u32 127, %v203_v51  ;;  %23 = vst.msk [vmem:[#allocation2] sm:$0x1] %vm22_vm6, %v328_v59 }
   0xa   :  { %v228_v0 = vshrl.u32 %v203_v51, 7  ;;  %s329_s3 = smov [#allocation3]  }
   0xb   :  { %43 = vperm.xlu0 %297, %v33_v11   ;;  %53 = vperm.xlu1 %298, %v35_v12   ;;  %vm208_vm5 = vcmp.lt.s32.totalorder %v204_v54, 8  ;;  %s248_s18 = sshll.u32 %s329_s3, 4  ;;  %s249_s18 = int_to_ptr.vmem [resolvable:$true] %s248_s18 }
   0xc   :  { %277 = vmatmul.mubr.msk.f32.vlgmr.msra.gmra.mrb[0].mxu0 %vm56_vm0, %v25_v13  ;;  %280 = vmatmul.mubr.msk.f32.vlgmr.msra.gmra.mrb[0].mxu1 %vm56_vm0, %v27_v14  ;;  %v229_v1 = vsub.s32 0, %v228_v0  ;;  %s303_s19 = scalar_lea.vmem %s249_s18, 16  ;;  %s307_s20 = scalar_lea.vmem %s249_s18, 32 }
   0xd   :  { %p304_p0 = scmp.ne.s32.totalorder %s249_s18, %s303_s19  ;;  %p308_p1 = scmp.lt.s32.totalorder %s249_s18, %s249_s18 }
   0xe   :  { %p309_p2 = scmp.lt.s32.totalorder %s307_s20, %s303_s19 }
   0xf   :  { %172 = vperm.xlu0 %297, %v166_v15   ;;  %177 = vperm.xlu1 %298, %v167_v16  }
  0x10   :  { %v211_v60 = vld [vmem:[#allocation2] sm:$0x1]  ;;  %p310_p3 = por %p309_p2, %p308_p1 }
  0x12   :  { %p311_p4 = pnand %p310_p3, %p304_p0 }
  0x13   :  { %182 = vperm.xlu0 %297, %v168_v17   ;;  %187 = vperm.xlu1 %298, %v169_v18  }
  0x86   :  { %v39_v19 = vpop.permute.xlu0 %38  ;;  %v49_v20 = vpop.permute.xlu1 %48 }
  0x8a   :  { %v44_v21 = vpop.permute.xlu0 %43  ;;  %v54_v22 = vpop.permute.xlu1 %53 }
  0x8e   :  { %v173_v29 = vpop.permute.xlu0 %172  ;;  %v178_v34 = vpop.permute.xlu1 %177 }
  0x92   :  { %v183_v42 = vpop.permute.xlu0 %182  ;;  %v188_v46 = vpop.permute.xlu1 %187 }
  0xdf   :  { %v278_v23 = vpop.f32.mrb[0].mxu0  ;;  %v281_v24 = vpop.f32.mrb[0].mxu1 }
  0xe0   :  { %v141_v25 = vadd.f32 %v278_v23, %v44_v21  ;;  %v151_v26 = vadd.f32 %v281_v24, %v54_v22  ;;  %v135_v27 = vpop.f32.mrb[1].mxu0  ;;  %v145_v28 = vpop.f32.mrb[1].mxu1 }
  0xe1   :  { %v136_v30 = vadd.f32 %v135_v27, %v39_v19  ;;  %v146_v31 = vadd.f32 %v145_v28, %v49_v20 }
  0xe2   :  { %vm155_vm1 = vcmp.ge.f32.partialorder %v141_v25, 0.0  ;;  %v159_v32 = vmul.f32 0.01, %v141_v25  ;;  %v161_v33 = vmul.f32 0.01, %v151_v26  ;;  %vm157_vm4 = vcmp.ge.f32.partialorder %v151_v26, 0.0 }
  0xe3   :  { %vm154_vm2 = vcmp.ge.f32.partialorder %v136_v30, 0.0  ;;  %v158_v35 = vmul.f32 0.01, %v136_v30  ;;  %vm156_vm3 = vcmp.ge.f32.partialorder %v146_v31, 0.0  ;;  %v160_v36 = vmul.f32 0.01, %v146_v31 }
  0xe4   :  { %v163_v37 = vsel %vm155_vm1, %v141_v25, %v159_v32  ;;  %v165_v43 = vsel %vm157_vm4, %v151_v26, %v161_v33 }
  0xe5   :  { %v191_v38 = vmul.f32 %v178_v34, %v163_v37  ;;  %v162_v39 = vsel %vm154_vm2, %v136_v30, %v158_v35  ;;  %v164_v40 = vsel %vm156_vm3, %v146_v31, %v160_v36  ;;  %v193_v47 = vmul.f32 %v188_v46, %v165_v43 }
  0xe6   :  { %v190_v41 = vmul.f32 %v173_v29, %v162_v39  ;;  %v192_v45 = vmul.f32 %v183_v42, %v164_v40 }
  0xe8   :  { %v194_v44 = vadd.f32 %v191_v38, %v190_v41 }
  0xea   :  { %v195_v48 = vadd.f32 %v194_v44, %v192_v45 }
  0xec   :  { %v196_v49 = vadd.f32 %v195_v48, %v193_v47 }
  0xee   :  { %v197_v50 = vrot.slane %v196_v49, 4 }
  0xf0   :  { %v198_v52 = vadd.f32 %v197_v50, %v196_v49 }
  0xf2   :  { %v199_v53 = vrot.slane %v198_v52, 2 }
  0xf4   :  { %v200_v55 = vadd.f32 %v199_v53, %v198_v52 }
  0xf6   :  { %v201_v56 = vrot.slane %v200_v55, 1 }
  0xf8   :  { %v202_v57 = vadd.f32 %v201_v56, %v200_v55 }
  0xfa   :  { %v209_v58 = vsel %vm208_vm5, %v202_v57, -1e+30 }
  0xfb   :  { %212 = vmax.xlane.f32.xlu0 %v209_v58  ;;  %210 = vst [vmem:[#allocation3] sm:$0x1] %v209_v58 }
 0x102   :  { %v220_v4 = vld [vmem:[#allocation3] sm:$0x1] }
 0x188   :  { %v213_v61 = vpop.xlane.xlu0 %212 }
 0x189   :  { %v214_v62 = vmax.f32 %v211_v60, %v213_v61 }
 0x18b   :  { %216 = vst.msk [vmem:[#allocation2] sm:$0x1] %vm22_vm6, %v214_v62 }
 0x192   :  { %v221_v63 = vld [vmem:[#allocation2] sm:$0x1] }
 0x193   :  { %224 = vperm.xlu1 %298, %v221_v63  }
 0x212   :  { %v225_v2 = vpop.permute.xlu1 %224 }
 0x213   :  { %v230_v3 = vrot.slane %v225_v2, %v229_v1 }
 0x215   :  { %v231_v5 = vsub.f32 %v220_v4, %v230_v3 }
 0x217   :  { %v232_v6 = vmul.f32 1.442695, %v231_v5 }
 0x219   :  { %299 = vpow2.f32 %v232_v6 }
 0x223   :  { %v300_v7 = vpop.eup %299 }
 0x224   :  { %v235_v8 = vsel %vm234_vm7, %v300_v7, 0.0 }
 0x225   :  { %236 = vadd.xlane.f32.xlu1 %v235_v8 }
 0x2b2   :  { %v237_v9 = vpop.xlane.xlu1 %236 }
 0x2b3   :  { %301 = vrcp.f32 %v237_v9 }
 0x2bd   :  { %v302_v10 = vpop.eup %301 }
 0x2be   :  { %v240_v11 = vmul.f32 %v302_v10, %v300_v7 }
 0x2c0   :  { %241 = vst [vmem:[#allocation3] sm:$0x1] %v240_v11 }
 0x2c1   :  { %314 = shalt.err (!%p311_p4)
}
 0x2c2   :  { %s315_s23 = scalar_lea.hbm %s423_s4, 16 }
 0x2c3   :  { %p316_p5 = scmp.ne.s32.totalorder %s423_s4, %s315_s23  ;;  %p319_p6 = scmp.lt.u32.totalorder %s315_s23, %s423_s4 }
 0x2c5   :  { %p321_p7 = pnand %p319_p6, %p316_p5 }
 0x2c7   :  { %324 = shalt.err (!%p321_p7)
}
 0x2c8   :  { %251 = dma.vmem_to_hbm [thread:$0]  %s249_s18, 16, %s423_s4, [#allocation4]  }
 0x2c9   :  { %325 = dma.done.wait [#allocation4], 16  }
 0x2ca   :  { %326 = vsyncadd [#allocation4], 4294967280 }
 0x2cb   :  { %255 = vsyncpa [#allocation4], 1 }

</bundles_post_ra>
